<compile_context>
chip_gen: v6e
topology: v6e:2x2x1
jax: 0.10.0
libtpu: 0.0.40
codegen_flags: <defaults>
</compile_context>

<pallas_src>
import jax
import jax.numpy as jnp
from jax.experimental import pallas as pl
from jax.experimental.pallas import tpu as pltpu


D_IN, H1, H2, D_OUT = 784, 256, 128, 10
D_OUT_PAD = 128   # 10 rounded up to a full lane width (lane-dense output)


def _round_up(x, m):
    return (x + m - 1) // m * m


def _pick_tile(B):
    """Batch tile size.

    - <=128:    a single sublane-packed tile (multiple of 16 for bf16 packing)
    - 129..512: split into exactly 2 tiles -> grid == 2 keeps both v7x
                TensorCores busy with dimension_semantics=("parallel",)
    - larger:   256/512-row tiles — fills the 256-wide MXU M dim on v6e/v7x
                and amortizes per-grid-step overhead, grid length stays >= 2.
    """
    if B <= 128:
        return _round_up(B, 16)
    if B <= 512:
        return _round_up((B + 1) // 2, 16)
    if B <= 2048:
        return 256
    return 512


def mlp_kernel(x_ref, w1_ref, b1_ref, w2_ref, b2_ref, w3_ref, b3_ref, o_ref):
    # x arrives unpadded as f32 (no wrapper-side pad/cast pass over HBM);
    # the bf16 cast happens here and hides under the input DMA pipeline.
    x = x_ref[...].astype(jnp.bfloat16)
    # fc1 + ReLU : bf16 operands, f32 MXU accumulation, f32 epilogue.
    h1 = jnp.dot(x, w1_ref[...], preferred_element_type=jnp.float32)
    h1 = jnp.maximum(h1 + b1_ref[...], 0.0).astype(jnp.bfloat16)
    # fc2 + ReLU
    h2 = jnp.dot(h1, w2_ref[...], preferred_element_type=jnp.float32)
    h2 = jnp.maximum(h2 + b2_ref[...], 0.0).astype(jnp.bfloat16)
    # fc3 (output padded to 128 lanes; written as bf16 to halve writeback)
    h3 = jnp.dot(h2, w3_ref[...], preferred_element_type=jnp.float32)
    o_ref[...] = (h3 + b3_ref[...]).astype(o_ref.dtype)


def prepare_params(params):
    """One-time parameter prep (bf16 cast + fc3 output-dim padding).

    Hoisted out of the per-call path so the casts/pads are not re-materialized
    in HBM on every forward call.
    """
    w1, b1, w2, b2, w3, b3 = params
    w1b = w1.astype(jnp.bfloat16)                                    # (784, 256)
    w2b = w2.astype(jnp.bfloat16)                                    # (256, 128)
    w3p = jnp.zeros((H2, D_OUT_PAD), jnp.bfloat16).at[:, :D_OUT].set(
        w3.astype(jnp.bfloat16))                                     # (128, 128)
    b1f = b1.astype(jnp.float32).reshape(1, H1)
    b2f = b2.astype(jnp.float32).reshape(1, H2)
    b3p = jnp.zeros((1, D_OUT_PAD), jnp.float32).at[:, :D_OUT].set(
        b3.astype(jnp.float32).reshape(1, D_OUT))
    return (w1b, b1f, w2b, b2f, w3p, b3p)


def net_forward(x, prepped_params):
    """x: [B, 1, 28, 28] or [B, 784]. Returns f32 logits [B, 10]."""
    w1b, b1f, w2b, b2f, w3p, b3p = prepped_params
    x2d = x.reshape(-1, D_IN).astype(jnp.float32)
    B = x2d.shape[0]

    TM = _pick_tile(B)
    Bp = _round_up(B, TM)
    if Bp != B:  # only minimal row padding; no K pad, no dtype copy of x
        x2d = jnp.pad(x2d, ((0, Bp - B), (0, 0)))

    # Weights/biases: same block index every grid step -> VMEM-resident,
    # DMA amortized across the batch grid.
    resident = lambda shape: pl.BlockSpec(shape, lambda i: (0, 0))

    flops = 2 * Bp * (D_IN * H1 + H1 * H2 + H2 * D_OUT_PAD)
    bytes_accessed = (
        Bp * D_IN * 4                                   # x read (f32)
        + Bp * D_OUT_PAD * 2                            # out write (bf16)
        + (D_IN * H1 + H1 * H2 + H2 * D_OUT_PAD) * 2    # bf16 weights
        + (H1 + H2 + D_OUT_PAD) * 4)                    # f32 biases

    out = pl.pallas_call(
        mlp_kernel,
        out_shape=jax.ShapeDtypeStruct((Bp, D_OUT_PAD), jnp.bfloat16),
        grid=(Bp // TM,),
        in_specs=[
            pl.BlockSpec((TM, D_IN), lambda i: (i, 0)),            # x tile (f32)
            resident((D_IN, H1)), resident((1, H1)),               # fc1
            resident((H1, H2)), resident((1, H2)),                 # fc2
            resident((H2, D_OUT_PAD)), resident((1, D_OUT_PAD)),   # fc3 (padded)
        ],
        out_specs=pl.BlockSpec((TM, D_OUT_PAD), lambda i: (i, 0)),
        compiler_params=pltpu.CompilerParams(
            dimension_semantics=("parallel",),   # v7x: shard batch on 2 TCs
            vmem_limit_bytes=32 * 1024 * 1024,
        ),
        cost_estimate=pl.CostEstimate(
            flops=flops, transcendentals=0, bytes_accessed=bytes_accessed),
    )(x2d, w1b, b1f, w2b, b2f, w3p, b3p)

    return out[:B, :D_OUT].astype(jnp.float32)


def init_params(key):
    """Deterministic init matching nn.Linear shapes (weights stored as [in, out])."""
    ks = jax.random.split(key, 6)

    def linear(kw, kb, fan_in, fan_out):
        # PyTorch default init: U(-1/sqrt(fan_in), 1/sqrt(fan_in))
        bound = 1.0 / jnp.sqrt(fan_in)
        w = jax.random.uniform(kw, (fan_in, fan_out), jnp.float32, -bound, bound)
        b = jax.random.uniform(kb, (1, fan_out), jnp.float32, -bound, bound)
        return w, b

    w1, b1 = linear(ks[0], ks[1], D_IN, H1)
    w2, b2 = linear(ks[2], ks[3], H1, H2)
    w3, b3 = linear(ks[4], ks[5], H2, D_OUT)
    return (w1, b1, w2, b2, w3, b3)


if __name__ == "__main__":
    key = jax.random.PRNGKey(0)
    k_params, k_x = jax.random.split(key)

    params = init_params(k_params)
    prepped = prepare_params(params)                 # one-time weight prep
    x = jax.random.normal(k_x, (8, 1, 28, 28), dtype=jnp.float32)  # NCHW

    out = net_forward(x, prepped)
    out = jax.block_until_ready(out)
    assert out.shape == (8, 10)

    w1, b1, w2, b2, w3, b3 = params
    x2d = x.reshape(-1, D_IN)

    # Reference 1: same bf16-weight / f32-accumulate math in plain JAX (tight;
    # tolerance widened slightly for the bf16 output rounding).
    bf = lambda a: a.astype(jnp.bfloat16)
    r1 = jnp.maximum(
        jnp.dot(bf(x2d), bf(w1), preferred_element_type=jnp.float32) + b1, 0.0)
    r2 = jnp.maximum(
        jnp.dot(bf(r1), bf(w2), preferred_element_type=jnp.float32) + b2, 0.0)
    ref_bf16 = jnp.dot(bf(r2), bf(w3), preferred_element_type=jnp.float32) + b3
    assert jnp.allclose(out, ref_bf16, atol=2e-2, rtol=2e-2)

    # Reference 2: full-f32 PyTorch-equivalent math (loose; bf16 weight cast).
    f1 = jnp.maximum(x2d @ w1 + b1, 0.0)
    f2 = jnp.maximum(f1 @ w2 + b2, 0.0)
    ref_f32 = f2 @ w3 + b3
    assert jnp.allclose(out, ref_f32, atol=6e-2, rtol=6e-2)

    print("KERNEL_OK")
</pallas_src>

<mosaic_0001>
module attributes {stable_mosaic.version = 11 : i64} {
  func.func @mlp_kernel(%arg0: i32, %arg1: memref<16x784xf32, #tpu.memory_space<vmem>>, %arg2: memref<784x256xbf16, #tpu.memory_space<vmem>>, %arg3: memref<1x256xf32, #tpu.memory_space<vmem>>, %arg4: memref<256x128xbf16, #tpu.memory_space<vmem>>, %arg5: memref<1x128xf32, #tpu.memory_space<vmem>>, %arg6: memref<128x128xbf16, #tpu.memory_space<vmem>>, %arg7: memref<1x128xf32, #tpu.memory_space<vmem>>, %arg8: memref<16x128xbf16, #tpu.memory_space<vmem>>) attributes {dimension_semantics = [#tpu.dimension_semantics<parallel>], iteration_bounds = array<i64: 1>, scalar_prefetch = 0 : i64, scratch_operands = 0 : i64, tpu.core_type = #tpu.core_type<tc>, window_params = [{transform_indices = @transform_0, window_bounds = array<i64: 16, 784>}, {pipeline_mode = #tpu.pipeline_mode<synchronous>, transform_indices = @transform_1, window_bounds = array<i64: 784, 256>}, {pipeline_mode = #tpu.pipeline_mode<synchronous>, transform_indices = @transform_2, window_bounds = array<i64: 1, 256>}, {pipeline_mode = #tpu.pipeline_mode<synchronous>, transform_indices = @transform_3, window_bounds = array<i64: 256, 128>}, {pipeline_mode = #tpu.pipeline_mode<synchronous>, transform_indices = @transform_4, window_bounds = array<i64: 1, 128>}, {pipeline_mode = #tpu.pipeline_mode<synchronous>, transform_indices = @transform_5, window_bounds = array<i64: 128, 128>}, {pipeline_mode = #tpu.pipeline_mode<synchronous>, transform_indices = @transform_6, window_bounds = array<i64: 1, 128>}, {transform_indices = @transform_7, window_bounds = array<i64: 16, 128>}]} {
    %c0 = arith.constant 0 : index
    %c0_0 = arith.constant 0 : index
    %0 = vector.load %arg1[%c0, %c0_0] : memref<16x784xf32, #tpu.memory_space<vmem>>, vector<16x784xf32>
    %1 = arith.truncf %0 : vector<16x784xf32> to vector<16x784xbf16>
    %c0_1 = arith.constant 0 : index
    %c0_2 = arith.constant 0 : index
    %2 = vector.load %arg2[%c0_1, %c0_2] : memref<784x256xbf16, #tpu.memory_space<vmem>>, vector<784x256xbf16>
    %cst = arith.constant dense<0.000000e+00> : vector<16x256xf32>
    %3 = tpu.matmul %1, %2, %cst {dimension_numbers = #tpu.dot_dimension_numbers<[1], [0], [0], [1], [0, 0, 1, 1], [], []>} : vector<16x784xbf16>, vector<784x256xbf16>, vector<16x256xf32> -> vector<16x256xf32>
    %c0_3 = arith.constant 0 : index
    %c0_4 = arith.constant 0 : index
    %4 = vector.load %arg3[%c0_3, %c0_4] : memref<1x256xf32, #tpu.memory_space<vmem>>, vector<1x256xf32>
    %5 = vector.broadcast %4 : vector<1x256xf32> to vector<16x256xf32>
    %6 = arith.addf %3, %5 : vector<16x256xf32>
    %cst_5 = arith.constant 0.000000e+00 : f32
    %7 = vector.broadcast %cst_5 : f32 to vector<16x256xf32>
    %8 = arith.maximumf %6, %7 : vector<16x256xf32>
    %9 = arith.truncf %8 : vector<16x256xf32> to vector<16x256xbf16>
    %c0_6 = arith.constant 0 : index
    %c0_7 = arith.constant 0 : index
    %10 = vector.load %arg4[%c0_6, %c0_7] : memref<256x128xbf16, #tpu.memory_space<vmem>>, vector<256x128xbf16>
    %cst_8 = arith.constant dense<0.000000e+00> : vector<16x128xf32>
    %11 = tpu.matmul %9, %10, %cst_8 {dimension_numbers = #tpu.dot_dimension_numbers<[1], [0], [0], [1], [0, 0, 1, 1], [], []>} : vector<16x256xbf16>, vector<256x128xbf16>, vector<16x128xf32> -> vector<16x128xf32>
    %c0_9 = arith.constant 0 : index
    %c0_10 = arith.constant 0 : index
    %12 = vector.load %arg5[%c0_9, %c0_10] : memref<1x128xf32, #tpu.memory_space<vmem>>, vector<1x128xf32>
    %13 = vector.broadcast %12 : vector<1x128xf32> to vector<16x128xf32>
    %14 = arith.addf %11, %13 : vector<16x128xf32>
    %cst_11 = arith.constant 0.000000e+00 : f32
    %15 = vector.broadcast %cst_11 : f32 to vector<16x128xf32>
    %16 = arith.maximumf %14, %15 : vector<16x128xf32>
    %17 = arith.truncf %16 : vector<16x128xf32> to vector<16x128xbf16>
    %c0_12 = arith.constant 0 : index
    %c0_13 = arith.constant 0 : index
    %18 = vector.load %arg6[%c0_12, %c0_13] : memref<128x128xbf16, #tpu.memory_space<vmem>>, vector<128x128xbf16>
    %cst_14 = arith.constant dense<0.000000e+00> : vector<16x128xf32>
    %19 = tpu.matmul %17, %18, %cst_14 {dimension_numbers = #tpu.dot_dimension_numbers<[1], [0], [0], [1], [0, 0, 1, 1], [], []>} : vector<16x128xbf16>, vector<128x128xbf16>, vector<16x128xf32> -> vector<16x128xf32>
    %c0_15 = arith.constant 0 : index
    %c0_16 = arith.constant 0 : index
    %20 = vector.load %arg7[%c0_15, %c0_16] : memref<1x128xf32, #tpu.memory_space<vmem>>, vector<1x128xf32>
    %21 = vector.broadcast %20 : vector<1x128xf32> to vector<16x128xf32>
    %22 = arith.addf %19, %21 : vector<16x128xf32>
    %23 = arith.truncf %22 : vector<16x128xf32> to vector<16x128xbf16>
    %c0_17 = arith.constant 0 : index
    %c0_18 = arith.constant 0 : index
    %24 = vector.load %arg8[%c0_17, %c0_18] : memref<16x128xbf16, #tpu.memory_space<vmem>>, vector<16x128xbf16>
    tpu.vector_store %arg8[%c0_17, %c0_18], %23 {strides = array<i32>} : memref<16x128xbf16, #tpu.memory_space<vmem>>, vector<16x128xbf16>,
    return
  }
  func.func @transform_0(%arg0: i32) -> (i32, i32) {
    %c0_i32 = arith.constant 0 : i32
    %c0_i32_0 = arith.constant 0 : i32
    return %arg0, %c0_i32 : i32, i32
  }
  func.func @transform_1(%arg0: i32) -> (i32, i32) {
    %c0_i32 = arith.constant 0 : i32
    %c0_i32_0 = arith.constant 0 : i32
    %c0_i32_1 = arith.constant 0 : i32
    return %c0_i32, %c0_i32_0 : i32, i32
  }
  func.func @transform_2(%arg0: i32) -> (i32, i32) {
    %c0_i32 = arith.constant 0 : i32
    %c0_i32_0 = arith.constant 0 : i32
    %c0_i32_1 = arith.constant 0 : i32
    return %c0_i32, %c0_i32_0 : i32, i32
  }
  func.func @transform_3(%arg0: i32) -> (i32, i32) {
    %c0_i32 = arith.constant 0 : i32
    %c0_i32_0 = arith.constant 0 : i32
    %c0_i32_1 = arith.constant 0 : i32
    return %c0_i32, %c0_i32_0 : i32, i32
  }
  func.func @transform_4(%arg0: i32) -> (i32, i32) {
    %c0_i32 = arith.constant 0 : i32
    %c0_i32_0 = arith.constant 0 : i32
    %c0_i32_1 = arith.constant 0 : i32
    return %c0_i32, %c0_i32_0 : i32, i32
  }
  func.func @transform_5(%arg0: i32) -> (i32, i32) {
    %c0_i32 = arith.constant 0 : i32
    %c0_i32_0 = arith.constant 0 : i32
    %c0_i32_1 = arith.constant 0 : i32
    return %c0_i32, %c0_i32_0 : i32, i32
  }
  func.func @transform_6(%arg0: i32) -> (i32, i32) {
    %c0_i32 = arith.constant 0 : i32
    %c0_i32_0 = arith.constant 0 : i32
    %c0_i32_1 = arith.constant 0 : i32
    return %c0_i32, %c0_i32_0 : i32, i32
  }
  func.func @transform_7(%arg0: i32) -> (i32, i32) {
    %c0_i32 = arith.constant 0 : i32
    %c0_i32_0 = arith.constant 0 : i32
    return %arg0, %c0_i32 : i32, i32
  }
}

</mosaic_0001>

<bundles_post_ra>
// kernel: tpu_custom_call.1
= control target key start
LH: loop header
LB: loop body
LE: loop exit
PB: predicated region body
PF: predicated region fallthrough
CT: control target
= control target key end

     0   :  { %12 = vsyncpa [#allocation3], 0  ;;  %s1780_s0 = inlined_call_operand.hbm [shape: f32[16,784], index: 0, kind: input, shape index: {}]   ;;  %s1781_s1 = inlined_call_operand.hbm [shape: bf16[784,256], index: 1, kind: input, shape index: {}]   ;;  %s1782_s2 = inlined_call_operand.vmem [shape: f32[1,256], index: 2, kind: input, shape index: {}]   ;;  %s1783_s3 = inlined_call_operand.hbm [shape: bf16[256,128], index: 3, kind: input, shape index: {}]   ;;  %s1784_s4 = inlined_call_operand.vmem [shape: f32[1,128], index: 4, kind: input, shape index: {}]   ;;  %s1785_s5 = inlined_call_operand.hbm [shape: bf16[128,128], index: 5, kind: input, shape index: {}]   ;;  %s1786_s6 = inlined_call_operand.vmem [shape: f32[1,128], index: 6, kind: input, shape index: {}]   ;;  %s1787_s7 = inlined_call_operand.hbm [shape: bf16[16,128], index: 7, kind: output, shape index: {}]  }
   0x1   :  { %13 = vsyncpa [#allocation6], 0 }
   0x2   :  { %14 = vsyncpa [#allocation9], 0 }
   0x3   :  { %15 = vsyncpa [#allocation4], 0  ;;  %s1684_s24 = smov [#allocation5]  }
   0x4   :  { %s33_s25 = sshll.u32 %s1684_s24, 4  ;;  %s34_s25 = int_to_ptr.vmem [resolvable:$true] %s33_s25 }
   0x5   :  { %s1584_s26 = scalar_lea.vmem %s34_s25, 12544  ;;  %p1589_p1 = scmp.lt.s32.totalorder %s34_s25, %s34_s25 }
   0x6   :  { %p1585_p0 = scmp.ne.s32.totalorder %s34_s25, %s1584_s26  ;;  %p1590_p2 = scmp.lt.s32.totalorder %s1584_s26, %s1584_s26 }
   0x8   :  { %p1591_p3 = por %p1590_p2, %p1589_p1 }
   0xa   :  { %p1592_p4 = pnand %p1591_p3, %p1585_p0 }
   0xc   :  { %1595 = shalt.err (!%p1592_p4)
}
   0xd   :  { %s1685_s27 = smov 128   ;;  %s1686_s28 = smov 8  }
   0xe   :  { %39 = dma.hbm_to_vmem [thread:$0]  %s1781_s1, 12544, %s34_s25, [#allocation6], %s1685_s27, %s1685_s27, %s1686_s28  }
   0xf   :  { %s1687_s8 = smov [#allocation2]  }
  0x10   :  { %s21_s9 = sshll.u32 %s1687_s8, 4  ;;  %s22_s9 = int_to_ptr.vmem [resolvable:$true] %s21_s9 }
  0x11   :  { %s1604_s10 = scalar_lea.vmem %s22_s9, 1792  ;;  %p1609_p6 = scmp.lt.s32.totalorder %s22_s9, %s22_s9 }
  0x12   :  { %p1605_p5 = scmp.ne.s32.totalorder %s22_s9, %s1604_s10  ;;  %p1610_p7 = scmp.lt.s32.totalorder %s1604_s10, %s1604_s10 }
  0x14   :  { %p1611_p8 = por %p1610_p7, %p1609_p6 }
  0x16   :  { %p1612_p9 = pnand %p1611_p8, %p1605_p5 }
  0x18   :  { %1615 = shalt.err (!%p1612_p9)
}
  0x19   :  { %s1688_s11 = smov 896   ;;  %s1689_s12 = smov 56  }
  0x1a   :  { %27 = dma.hbm_to_vmem [thread:$0]  %s1780_s0, 1792, %s22_s9, [#allocation3], %s1688_s11, %s1688_s11, %s1689_s12  }
  0x1b   :  { %s1690_s15 = smov [#allocation7]  }
  0x1c   :  { %s47_s16 = sshll.u32 %s1690_s15, 4  ;;  %s48_s16 = int_to_ptr.vmem [resolvable:$true] %s47_s16 }
  0x1d   :  { %s1624_s1 = scalar_lea.vmem %s48_s16, 2048  ;;  %p1629_p11 = scmp.lt.s32.totalorder %s48_s16, %s48_s16 }
  0x1e   :  { %p1625_p10 = scmp.ne.s32.totalorder %s48_s16, %s1624_s1  ;;  %p1630_p12 = scmp.lt.s32.totalorder %s1624_s1, %s1624_s1 }
  0x20   :  { %p1631_p13 = por %p1630_p12, %p1629_p11 }
  0x22   :  { %p1632_p0 = pnand %p1631_p13, %p1625_p10 }
  0x24   :  { %1635 = shalt.err (!%p1632_p0)
}
  0x25   :  { %s1691_s17 = smov 64   ;;  %s1692_s18 = smov 4  }
  0x26   :  { %53 = dma.hbm_to_vmem [thread:$0]  %s1783_s3, 2048, %s48_s16, [#allocation6], %s1691_s17, %s1691_s17, %s1692_s18  }
  0x27   :  { %s1693_s0 = smov [#allocation8]  }
  0x28   :  { %s61_s21 = sshll.u32 %s1693_s0, 4  ;;  %s62_s21 = int_to_ptr.vmem [resolvable:$true] %s61_s21 }
  0x29   :  { %s1644_s22 = scalar_lea.vmem %s62_s21, 1024  ;;  %p1649_p2 = scmp.lt.s32.totalorder %s62_s21, %s62_s21 }
  0x2a   :  { %p1645_p1 = scmp.ne.s32.totalorder %s62_s21, %s1644_s22  ;;  %p1650_p3 = scmp.lt.s32.totalorder %s1644_s22, %s1644_s22 }
  0x2c   :  { %p1651_p4 = por %p1650_p3, %p1649_p2 }
  0x2e   :  { %p1652_p5 = pnand %p1651_p4, %p1645_p1 }
  0x30   :  { %1655 = shalt.err (!%p1652_p5)
}
  0x31   :  { %67 = dma.hbm_to_vmem [thread:$0]  %s1785_s5, 1024, %s62_s21, [#allocation9], %s1691_s17, %s1691_s17, %s1692_s18  }
  0x32   :  { %1676 = dma.done.wait [#allocation3], 1792  }
  0x33   :  { %1677 = vsyncadd [#allocation3], 4294965504 }
  0x34   :  { %1678 = dma.done.wait [#allocation6], 14592  }
  0x35   :  { %1679 = vsyncadd [#allocation6], 4294952704 }
  0x36   :  { %1680 = dma.done.wait [#allocation9], 1024  }
  0x37   :  { %1681 = vsyncadd [#allocation9], 4294966272  ;;  %v1405_v0 = vld [vmem:[#allocation5 + $0x74] ss:$8 sps:$4 sm:$0xff]   ;;  %v1407_v1 = vld [vmem:[#allocation5 + $0x70] ss:$8 sps:$4 sm:$0xff]  }
  0x38   :  { %708 = vmatprep.subr.bf16.mxu0 %v1405_v0  ;;  %v1408_v2 = vld [vmem:[#allocation5 + $0x174] ss:$8 sps:$4 sm:$0xff]   ;;  %v1410_v3 = vld [vmem:[#allocation5 + $0x170] ss:$8 sps:$4 sm:$0xff]   ;;  %v1411_v4 = vld [vmem:[#allocation5 + $0x64] ss:$8 sps:$4 sm:$0xff]  }
  0x39   :  { %709 = vmatpush1.bf16.msra.mxu0 %v1407_v1  ;;  %v1413_v5 = vld [vmem:[#allocation5 + $0x60] ss:$8 sps:$4 sm:$0xff]   ;;  %751 = vmatprep.subr.bf16.mxu1 %v1408_v2  ;;  %v1414_v6 = vld [vmem:[#allocation5 + $0x164] ss:$8 sps:$4 sm:$0xff]   ;;  %v1417_v8 = vld [vmem:[#allocation5 + $0x54] ss:$8 sps:$4 sm:$0xff]  }
  0x3a   :  { %752 = vmatpush1.bf16.msra.mxu1 %v1410_v3  ;;  %710 = vmatprep.subr.bf16.mxu0 %v1411_v4  ;;  %v1416_v7 = vld [vmem:[#allocation5 + $0x160] ss:$8 sps:$4 sm:$0xff]   ;;  %v1419_v9 = vld [vmem:[#allocation5 + $0x50] ss:$8 sps:$4 sm:$0xff]   ;;  %v1420_v10 = vld [vmem:[#allocation5 + $0x154] ss:$8 sps:$4 sm:$0xff]  }
  0x3b   :  { %753 = vmatprep.subr.bf16.mxu1 %v1414_v6  ;;  %v1423_v11 = vld [vmem:[#allocation5 + $0x44] ss:$8 sps:$4 sm:$0xff]   ;;  %v1422_v12 = vld [vmem:[#allocation5 + $0x150] ss:$8 sps:$4 sm:$0xff]   ;;  %v1425_v14 = vld [vmem:[#allocation5 + $0x40] ss:$8 sps:$4 sm:$0xff]  }
  0x3c   :  { %v1426_v13 = vld [vmem:[#allocation5 + $0x144] ss:$8 sps:$4 sm:$0xff]   ;;  %v1429_v15 = vld [vmem:[#allocation5 + $0x34] ss:$8 sps:$4 sm:$0xff]   ;;  %v1428_v16 = vld [vmem:[#allocation5 + $0x140] ss:$8 sps:$4 sm:$0xff]  }
  0x3d   :  { %711 = vmatpush1.bf16.msra.mxu0 %v1413_v5  ;;  %v1432_v17 = vld [vmem:[#allocation5 + $0x134] ss:$8 sps:$4 sm:$0xff]   ;;  %v1431_v18 = vld [vmem:[#allocation5 + $0x30] ss:$8 sps:$4 sm:$0xff]   ;;  %v1435_v19 = vld [vmem:[#allocation5 + $0x24] ss:$8 sps:$4 sm:$0xff]  }
  0x3e   :  { %712 = vmatprep.subr.bf16.mxu0 %v1417_v8  ;;  %754 = vmatpush1.bf16.msra.mxu1 %v1416_v7  ;;  %v1434_v20 = vld [vmem:[#allocation5 + $0x130] ss:$8 sps:$4 sm:$0xff]   ;;  %v1438_v21 = vld [vmem:[#allocation5 + $0x124] ss:$8 sps:$4 sm:$0xff]   ;;  %v1437_v22 = vld [vmem:[#allocation5 + $0x20] ss:$8 sps:$4 sm:$0xff]  }
  0x3f   :  { %755 = vmatprep.subr.bf16.mxu1 %v1420_v10  ;;  %v1441_v23 = vld [vmem:[#allocation5 + $0x14] ss:$8 sps:$4 sm:$0xff]   ;;  %v1440_v24 = vld [vmem:[#allocation5 + $0x120] ss:$8 sps:$4 sm:$0xff]   ;;  %v1443_v26 = vld [vmem:[#allocation5 + $0x10] ss:$8 sps:$4 sm:$0xff]  }
  0x40   :  { %v1444_v25 = vld [vmem:[#allocation5 + $0x114] ss:$8 sps:$4 sm:$0xff]   ;;  %v1447_v27 = vld [vmem:[#allocation5 + $0x4] ss:$8 sps:$4 sm:$0xff]   ;;  %v1446_v28 = vld [vmem:[#allocation5 + $0x110] ss:$8 sps:$4 sm:$0xff]  }
  0x41   :  { %713 = vmatpush1.bf16.msra.mxu0 %v1419_v9  ;;  %v1450_v29 = vld [vmem:[#allocation5 + $0x104] ss:$8 sps:$4 sm:$0xff]   ;;  %v1449_v30 = vld [vmem:[#allocation5] ss:$8 sps:$4 sm:$0xff]   ;;  %v1453_v31 = vld [vmem:[#allocation5 + $0xf4] ss:$8 sps:$4 sm:$0xff]  }
  0x42   :  { %714 = vmatprep.subr.bf16.mxu0 %v1423_v11  ;;  %756 = vmatpush1.bf16.msra.mxu1 %v1422_v12  ;;  %v1452_v32 = vld [vmem:[#allocation5 + $0x100] ss:$8 sps:$4 sm:$0xff]   ;;  %v1456_v33 = vld [vmem:[#allocation5 + $0x1f4] ss:$8 sps:$4 sm:$0xff]   ;;  %v1455_v34 = vld [vmem:[#allocation5 + $0xf0] ss:$8 sps:$4 sm:$0xff]  }
  0x43   :  { %757 = vmatprep.subr.bf16.mxu1 %v1426_v13  ;;  %v1459_v35 = vld [vmem:[#allocation5 + $0xe4] ss:$8 sps:$4 sm:$0xff]   ;;  %v1458_v36 = vld [vmem:[#allocation5 + $0x1f0] ss:$8 sps:$4 sm:$0xff]   ;;  %v1461_v38 = vld [vmem:[#allocation5 + $0xe0] ss:$8 sps:$4 sm:$0xff]  }
  0x44   :  { %v1462_v37 = vld [vmem:[#allocation5 + $0x1e4] ss:$8 sps:$4 sm:$0xff]   ;;  %v1465_v39 = vld [vmem:[#allocation5 + $0xd4] ss:$8 sps:$4 sm:$0xff]   ;;  %v1464_v40 = vld [vmem:[#allocation5 + $0x1e0] ss:$8 sps:$4 sm:$0xff]  }
  0x45   :  { %715 = vmatpush1.bf16.msra.mxu0 %v1425_v14  ;;  %v1468_v41 = vld [vmem:[#allocation5 + $0x1d4] ss:$8 sps:$4 sm:$0xff]   ;;  %v1467_v42 = vld [vmem:[#allocation5 + $0xd0] ss:$8 sps:$4 sm:$0xff]   ;;  %v1471_v43 = vld [vmem:[#allocation5 + $0xc4] ss:$8 sps:$4 sm:$0xff]  }
  0x46   :  { %716 = vmatprep.subr.bf16.mxu0 %v1429_v15  ;;  %758 = vmatpush1.bf16.msra.mxu1 %v1428_v16  ;;  %v1470_v44 = vld [vmem:[#allocation5 + $0x1d0] ss:$8 sps:$4 sm:$0xff]   ;;  %v1474_v45 = vld [vmem:[#allocation5 + $0x1c4] ss:$8 sps:$4 sm:$0xff]   ;;  %v1473_v48 = vld [vmem:[#allocation5 + $0xc0] ss:$8 sps:$4 sm:$0xff]  }
  0x47   :  { %759 = vmatprep.subr.bf16.mxu1 %v1432_v17  ;;  %v84_v46 = vld [vmem:[#allocation2 + $0x8] sm:$0xff]  ;;  %v91_v47 = vld [vmem:[#allocation2 + $0x40] sm:$0xff]  ;;  %v1476_v51 = vld [vmem:[#allocation5 + $0x1c0] ss:$8 sps:$4 sm:$0xff]   ;;  %vm704_vm0 = vcmask 130048   ;;  %vm1696_vm1 = vmmov 0  }
  0x48   :  { %v98_v49 = vpack.c.bf16 %v91_v47, %v84_v46  ;;  %v1477_v50 = vld [vmem:[#allocation5 + $0xb4] ss:$8 sps:$4 sm:$0xff]   ;;  %v86_v52 = vld [vmem:[#allocation2 + $0x18] sm:$0xff]  ;;  %v93_v53 = vld [vmem:[#allocation2 + $0x50] sm:$0xff]  ;;  %s1697_s28 = smov [#allocation10]  }
  0x49   :  { %717 = vmatpush1.bf16.msra.mxu0 %v1431_v18  ;;  %v1480_v54 = vld [vmem:[#allocation5 + $0x1b4] ss:$8 sps:$4 sm:$0xff]   ;;  %v100_v55 = vpack.c.bf16 %v93_v53, %v86_v52  ;;  %v1479_v56 = vld [vmem:[#allocation5 + $0xb0] ss:$8 sps:$4 sm:$0xff]   ;;  %v1483_v57 = vld [vmem:[#allocation5 + $0xa4] ss:$8 sps:$4 sm:$0xff]  }
  0x4a   :  { %718 = vmatprep.subr.bf16.mxu0 %v1435_v19  ;;  %760 = vmatpush1.bf16.msra.mxu1 %v1434_v20  ;;  %v1482_v58 = vld [vmem:[#allocation5 + $0x1b0] ss:$8 sps:$4 sm:$0xff]   ;;  %v1486_v59 = vld [vmem:[#allocation5 + $0x1a4] ss:$8 sps:$4 sm:$0xff]   ;;  %v1485_v60 = vld [vmem:[#allocation5 + $0xa0] ss:$8 sps:$4 sm:$0xff]  }
  0x4b   :  { %761 = vmatprep.subr.bf16.mxu1 %v1438_v21  ;;  %740 = vmatprep.mubr.bf16.mxu0 %v98_v49  ;;  %v1489_v61 = vld [vmem:[#allocation5 + $0x94] ss:$8 sps:$4 sm:$0xff]   ;;  %v1488_v62 = vld [vmem:[#allocation5 + $0x1a0] ss:$8 sps:$4 sm:$0xff]   ;;  %v1491_v0 = vld [vmem:[#allocation5 + $0x90] ss:$8 sps:$4 sm:$0xff]  }
  0x4c   :  { %783 = vmatprep.mubr.bf16.mxu1 %v100_v55  ;;  %v1492_v63 = vld [vmem:[#allocation5 + $0x194] ss:$8 sps:$4 sm:$0xff]   ;;  %v1494_v1 = vld [vmem:[#allocation5 + $0x190] ss:$8 sps:$4 sm:$0xff]   ;;  %v1495_v2 = vld [vmem:[#allocation5 + $0x84] ss:$8 sps:$4 sm:$0xff]  }
  0x4d   :  { %719 = vmatpush1.bf16.msra.mxu0 %v1437_v22  ;;  %v1497_v3 = vld [vmem:[#allocation5 + $0x80] ss:$8 sps:$4 sm:$0xff]   ;;  %v1498_v4 = vld [vmem:[#allocation5 + $0x184] ss:$8 sps:$4 sm:$0xff]   ;;  %v83_v5 = vld [vmem:[#allocation2] sm:$0xff]  ;;  %v1694_v21 = vmov 0  }
  0x4e   :  { %720 = vmatprep.subr.bf16.mxu0 %v1441_v23  ;;  %762 = vmatpush1.bf16.msra.mxu1 %v1440_v24  ;;  %v1500_v6 = vld [vmem:[#allocation5 + $0x180] ss:$8 sps:$4 sm:$0xff]   ;;  %v1503_v8 = vld [vmem:[#allocation5 + $0x274] ss:$8 sps:$4 sm:$0xff]   ;;  %v1501_v12 = vld [vmem:[#allocation5 + $0x270] ss:$8 sps:$4 sm:$0xff]  }
  0x4f   :  { %763 = vmatprep.subr.bf16.mxu1 %v1444_v25  ;;  %v90_v7 = vld [vmem:[#allocation2 + $0x38] sm:$0xff]  ;;  %v85_v9 = vld [vmem:[#allocation2 + $0x10] sm:$0xff]  ;;  %v92_v10 = vld [vmem:[#allocation2 + $0x48] sm:$0xff]  ;;  %s1192_s29 = sshll.u32 %s1697_s28, 4  ;;  %s1193_s29 = int_to_ptr.vmem [resolvable:$true] %s1192_s29 }
  0x50   :  { %v97_v11 = vpack.c.bf16 %v90_v7, %v83_v5  ;;  %v99_v13 = vpack.c.bf16 %v92_v10, %v85_v9  ;;  %v1506_v14 = vld [vmem:[#allocation5 + $0x264] ss:$8 sps:$4 sm:$0xff]   ;;  %v1546_v15 = vld [vmem:[#allocation5 + $0x300] ss:$8 sps:$4 sm:$0xff]   ;;  %v1509_v18 = vld [vmem:[#allocation5 + $0x254] ss:$8 sps:$4 sm:$0xff]   ;;  %v204_v9 = vlaneseq  ;;  %p1661_p7 = scmp.lt.s32.totalorder %s1193_s29, %s1193_s29 }
  0x51   :  { %721 = vmatpush1.bf16.msra.mxu0 %v1443_v26  ;;  %v1548_v16 = vld [vmem:[#allocation5 + $0x304] ss:$8 sps:$4 sm:$0xff]   ;;  %v1504_v17 = vld [vmem:[#allocation5 + $0x260] ss:$8 sps:$4 sm:$0xff]   ;;  %v88_v19 = vld [vmem:[#allocation2 + $0x28] sm:$0xff] }
  0x52   :  { %722 = vmatprep.subr.bf16.mxu0 %v1447_v27  ;;  %764 = vmatpush1.bf16.msra.mxu1 %v1446_v28  ;;  %v1507_v20 = vld [vmem:[#allocation5 + $0x250] ss:$8 sps:$4 sm:$0xff]   ;;  %v89_v22 = vld [vmem:[#allocation2 + $0x30] sm:$0xff]  ;;  %v1545_v49 = vld [vmem:[#allocation5 + $0x294] ss:$8 sps:$4 sm:$0xff]  }
  0x53   :  { %765 = vmatprep.subr.bf16.mxu1 %v1450_v29  ;;  %v96_v23 = vld [vmem:[#allocation2 + $0x68] sm:$0xff]  ;;  %v95_v24 = vld [vmem:[#allocation2 + $0x60] sm:$0xff]  ;;  %v1512_v25 = vld [vmem:[#allocation5 + $0x244] ss:$8 sps:$4 sm:$0xff]  }
  0x54   :  { %v102_v26 = vpack.c.bf16 %v95_v24, %v88_v19  ;;  %v103_v27 = vpack.c.bf16 %v96_v23, %v89_v22  ;;  %v1510_v28 = vld [vmem:[#allocation5 + $0x240] ss:$8 sps:$4 sm:$0xff]   ;;  %v1515_v29 = vld [vmem:[#allocation5 + $0x234] ss:$8 sps:$4 sm:$0xff]   ;;  %v1537_v46 = vld [vmem:[#allocation5 + $0x2b0] ss:$8 sps:$4 sm:$0xff]  }
  0x55   :  { %723 = vmatpush1.bf16.msra.mxu0 %v1449_v30  ;;  %v1513_v30 = vld [vmem:[#allocation5 + $0x230] ss:$8 sps:$4 sm:$0xff]   ;;  %v1542_v47 = vld [vmem:[#allocation5 + $0x2a4] ss:$8 sps:$4 sm:$0xff]   ;;  %v1549_v52 = vld [vmem:[#allocation5 + $0x280] ss:$8 sps:$4 sm:$0xff]  }
  0x56   :  { %724 = vmatprep.subr.bf16.mxu0 %v1453_v31  ;;  %766 = vmatpush1.bf16.msra.mxu1 %v1452_v32  ;;  %v1518_v31 = vld [vmem:[#allocation5 + $0x224] ss:$8 sps:$4 sm:$0xff]   ;;  %v1516_v32 = vld [vmem:[#allocation5 + $0x220] ss:$8 sps:$4 sm:$0xff]   ;;  %v87_v53 = vld [vmem:[#allocation2 + $0x20] sm:$0xff] }
  0x57   :  { %767 = vmatprep.subr.bf16.mxu1 %v1456_v33  ;;  %v1521_v33 = vld [vmem:[#allocation5 + $0x214] ss:$8 sps:$4 sm:$0xff]  }
  0x58   :  { %v1565_v5 = vld [vmem:[#allocation7 + $0x8] sm:$0xff]   ;;  %v1567_v7 = vld [vmem:[#allocation7] sm:$0xff]  }
  0x59   :  { %725 = vmatpush2.bf16.msra.mxu0 %v1455_v34  ;;  %v1519_v34 = vld [vmem:[#allocation5 + $0x210] ss:$8 sps:$4 sm:$0xff]  }
  0x5a   :  { %726 = vmatprep.subr.bf16.mxu0 %v1459_v35  ;;  %768 = vmatpush2.bf16.msra.mxu1 %v1458_v36  ;;  %v1524_v35 = vld [vmem:[#allocation5 + $0x204] ss:$8 sps:$4 sm:$0xff]   ;;  %v1522_v36 = vld [vmem:[#allocation5 + $0x200] ss:$8 sps:$4 sm:$0xff]  }
  0x5b   :  { %769 = vmatprep.subr.bf16.mxu1 %v1462_v37  ;;  %v1527_v37 = vld [vmem:[#allocation5 + $0x2f4] ss:$8 sps:$4 sm:$0xff]  }
  0x5d   :  { %727 = vmatpush2.bf16.msra.mxu0 %v1461_v38  ;;  %v1525_v38 = vld [vmem:[#allocation5 + $0x2f0] ss:$8 sps:$4 sm:$0xff]  }
  0x5e   :  { %728 = vmatprep.subr.bf16.mxu0 %v1465_v39  ;;  %770 = vmatpush2.bf16.msra.mxu1 %v1464_v40  ;;  %v1530_v39 = vld [vmem:[#allocation5 + $0x2e4] ss:$8 sps:$4 sm:$0xff]   ;;  %v1528_v40 = vld [vmem:[#allocation5 + $0x2e0] ss:$8 sps:$4 sm:$0xff]  }
  0x5f   :  { %771 = vmatprep.subr.bf16.mxu1 %v1468_v41  ;;  %v1533_v41 = vld [vmem:[#allocation5 + $0x2d4] ss:$8 sps:$4 sm:$0xff]  }
  0x61   :  { %729 = vmatpush2.bf16.msra.mxu0 %v1467_v42  ;;  %v1531_v42 = vld [vmem:[#allocation5 + $0x2d0] ss:$8 sps:$4 sm:$0xff]  }
  0x62   :  { %730 = vmatprep.subr.bf16.mxu0 %v1471_v43  ;;  %772 = vmatpush2.bf16.msra.mxu1 %v1470_v44  ;;  %v1536_v43 = vld [vmem:[#allocation5 + $0x2c4] ss:$8 sps:$4 sm:$0xff]   ;;  %v1534_v44 = vld [vmem:[#allocation5 + $0x2c0] ss:$8 sps:$4 sm:$0xff]  }
  0x63   :  { %773 = vmatprep.subr.bf16.mxu1 %v1474_v45  ;;  %v1539_v45 = vld [vmem:[#allocation5 + $0x2b4] ss:$8 sps:$4 sm:$0xff]  }
  0x65   :  { %731 = vmatpush2.bf16.msra.mxu0 %v1473_v48  ;;  %v1540_v48 = vld [vmem:[#allocation5 + $0x2a0] ss:$8 sps:$4 sm:$0xff]  }
  0x66   :  { %732 = vmatprep.subr.bf16.mxu0 %v1477_v50  ;;  %774 = vmatpush2.bf16.msra.mxu1 %v1476_v51  ;;  %v1543_v50 = vld [vmem:[#allocation5 + $0x290] ss:$8 sps:$4 sm:$0xff]   ;;  %v1551_v51 = vld [vmem:[#allocation5 + $0x284] ss:$8 sps:$4 sm:$0xff]  }
  0x67   :  { %775 = vmatprep.subr.bf16.mxu1 %v1480_v54  ;;  %v94_v54 = vld [vmem:[#allocation2 + $0x58] sm:$0xff] }
  0x68   :  { %v101_v55 = vpack.c.bf16 %v94_v54, %v87_v53  ;;  %v1568_v53 = vld [vmem:[#allocation8 + $0x38] sm:$0xff]  }
  0x69   :  { %733 = vmatpush2.bf16.msra.mxu0 %v1479_v56  ;;  %v1552_v56 = vld [vmem:[#allocation7 + $0x78] sm:$0xff]  }
  0x6a   :  { %734 = vmatprep.subr.bf16.mxu0 %v1483_v57  ;;  %776 = vmatpush2.bf16.msra.mxu1 %v1482_v58  ;;  %v1553_v57 = vld [vmem:[#allocation7 + $0x38] sm:$0xff]   ;;  %v1554_v58 = vld [vmem:[#allocation7 + $0x70] sm:$0xff]  }
  0x6b   :  { %777 = vmatprep.subr.bf16.mxu1 %v1486_v59  ;;  %v1555_v59 = vld [vmem:[#allocation7 + $0x30] sm:$0xff]  }
  0x6d   :  { %735 = vmatpush2.bf16.msra.mxu0 %v1485_v60  ;;  %v1556_v60 = vld [vmem:[#allocation7 + $0x68] sm:$0xff]  }
  0x6e   :  { %736 = vmatprep.subr.bf16.mxu0 %v1489_v61  ;;  %778 = vmatpush2.bf16.msra.mxu1 %v1488_v62  ;;  %v1557_v61 = vld [vmem:[#allocation7 + $0x28] sm:$0xff]   ;;  %v1558_v62 = vld [vmem:[#allocation7 + $0x60] sm:$0xff]  }
  0x6f   :  { %779 = vmatprep.subr.bf16.mxu1 %v1492_v63  ;;  %v1559_v63 = vld [vmem:[#allocation7 + $0x20] sm:$0xff]  }
  0x71   :  { %737 = vmatpush2.bf16.msra.mxu0 %v1491_v0  ;;  %v1560_v0 = vld [vmem:[#allocation7 + $0x58] sm:$0xff]  }
  0x72   :  { %738 = vmatprep.subr.bf16.mxu0 %v1495_v2  ;;  %780 = vmatpush2.bf16.msra.mxu1 %v1494_v1  ;;  %v1561_v1 = vld [vmem:[#allocation7 + $0x18] sm:$0xff]   ;;  %v1562_v2 = vld [vmem:[#allocation7 + $0x50] sm:$0xff]  }
  0x73   :  { %781 = vmatprep.subr.bf16.mxu1 %v1498_v4  ;;  %v1564_v4 = vld [vmem:[#allocation7 + $0x48] sm:$0xff]  }
  0x75   :  { %739 = vmatpush2.bf16.msra.mxu0 %v1497_v3  ;;  %v1563_v3 = vld [vmem:[#allocation7 + $0x10] sm:$0xff]  }
  0x76   :  { %794 = vmatprep.subr.bf16.mxu0 %v1503_v8  ;;  %782 = vmatpush2.bf16.msra.mxu1 %v1500_v6  ;;  %v1566_v6 = vld [vmem:[#allocation7 + $0x40] sm:$0xff]   ;;  %v1695_v8 = vmov 0.0  }
  0x77   :  { %851 = vmatprep.subr.bf16.mxu1 %v1548_v16 }
  0x78   :  { %741 = vmatmul.mubr.bf16.vlgmr.msra.gmra.mxu0 %v97_v11  ;;  %v205_v11 = vshrl.u32 %v204_v9, 7 }
  0x79   :  { %795 = vmatpush1.bf16.msra.mxu0 %v1501_v12  ;;  %784 = vmatmul.mubr.bf16.vlgmr.msra.gmra.mxu1 %v99_v13 }
  0x7a   :  { %796 = vmatprep.subr.bf16.mxu0 %v1506_v14  ;;  %869 = vmatprep.mubr.bf16.mxu1 %v1694_v21  ;;  %v210_v14 = vsub.s32 1, %v205_v11  ;;  %v206_v16 = vsub.s32 0, %v205_v11 }
  0x7b   :  { %852 = vmatpush1.bf16.msra.mxu1 %v1546_v15  ;;  %826 = vmatprep.mubr.bf16.mxu0 %v102_v26  ;;  %v202_v15 = vld [vmem:[%s1782_s2] sm:$0x3] }
  0x7c   :  { %1340 = vmatprep.subr.bf16.mxu1 %v1552_v56  ;;  %v211_v19 = vrot.slane %v202_v15, %v210_v14  ;;  %v1570_v56 = vld [vmem:[#allocation8 + $0x28] sm:$0xff]  }
  0x7d   :  { %797 = vmatpush1.bf16.msra.mxu0 %v1504_v17 }
  0x7e   :  { %798 = vmatprep.subr.bf16.mxu0 %v1509_v18 }
  0x81   :  { %799 = vmatpush1.bf16.msra.mxu0 %v1507_v20  ;;  %1304 = vmatmul.mubr.msk.bf16.vlgmr.msra.gmra.mxu1 %vm704_vm0, %v103_v27  ;;  %v207_v20 = vrot.slane %v202_v15, %v206_v16 }
  0x82   :  { %800 = vmatprep.subr.bf16.mxu0 %v1512_v25  ;;  %1341 = vmatpush3.bf16.msra.mxu1 %v1553_v57  ;;  %v1571_v57 = vld [vmem:[#allocation8 + $0x20] sm:$0xff]  }
  0x83   :  { %1342 = vmatprep.subr.bf16.mxu1 %v1554_v58  ;;  %v1572_v58 = vld [vmem:[#allocation8 + $0x18] sm:$0xff]  }
  0x85   :  { %801 = vmatpush1.bf16.msra.mxu0 %v1510_v28 }
  0x86   :  { %802 = vmatprep.subr.bf16.mxu0 %v1515_v29  ;;  %1343 = vmatpush3.bf16.msra.mxu1 %v1555_v59  ;;  %v1573_v59 = vld [vmem:[#allocation8 + $0x10] sm:$0xff]  }
  0x87   :  { %1344 = vmatprep.subr.bf16.mxu1 %v1556_v60  ;;  %v1574_v60 = vld [vmem:[#allocation8 + $0x8] sm:$0xff]  }
  0x89   :  { %803 = vmatpush1.bf16.msra.mxu0 %v1513_v30 }
  0x8a   :  { %804 = vmatprep.subr.bf16.mxu0 %v1518_v31  ;;  %1345 = vmatpush3.bf16.msra.mxu1 %v1557_v61  ;;  %v1575_v61 = vld [vmem:[#allocation8] sm:$0xff]  }
  0x8b   :  { %1346 = vmatprep.subr.bf16.mxu1 %v1558_v62 }
  0x8d   :  { %805 = vmatpush1.bf16.msra.mxu0 %v1516_v32 }
  0x8e   :  { %806 = vmatprep.subr.bf16.mxu0 %v1521_v33  ;;  %1347 = vmatpush3.bf16.msra.mxu1 %v1559_v63 }
  0x8f   :  { %1348 = vmatprep.subr.bf16.mxu1 %v1560_v0 }
  0x91   :  { %807 = vmatpush1.bf16.msra.mxu0 %v1519_v34 }
  0x92   :  { %808 = vmatprep.subr.bf16.mxu0 %v1524_v35  ;;  %1349 = vmatpush3.bf16.msra.mxu1 %v1561_v1  ;;  %v1305_v1 = vld [vmem:[%s1784_s4] ss:$0 sm:$0xff]  ;;  %s1656_s4 = scalar_lea.vmem %s1193_s29, 128 }
  0x93   :  { %1350 = vmatprep.subr.bf16.mxu1 %v1562_v2  ;;  %p1657_p6 = scmp.ne.s32.totalorder %s1193_s29, %s1656_s4  ;;  %p1662_p8 = scmp.lt.s32.totalorder %s1656_s4, %s1656_s4 }
  0x95   :  { %809 = vmatpush1.bf16.msra.mxu0 %v1522_v36  ;;  %p1663_p9 = por %p1662_p8, %p1661_p7 }
  0x96   :  { %810 = vmatprep.subr.bf16.mxu0 %v1527_v37  ;;  %1351 = vmatpush3.bf16.msra.mxu1 %v1563_v3 }
  0x97   :  { %1352 = vmatprep.subr.bf16.mxu1 %v1564_v4  ;;  %p1664_p10 = pnand %p1663_p9, %p1657_p6 }
  0x99   :  { %811 = vmatpush2.bf16.msra.mxu0 %v1525_v38 }
  0x9a   :  { %812 = vmatprep.subr.bf16.mxu0 %v1530_v39  ;;  %1353 = vmatpush3.bf16.msra.mxu1 %v1565_v5 }
  0x9b   :  { %1354 = vmatprep.subr.bf16.mxu1 %v1566_v6 }
  0x9d   :  { %813 = vmatpush2.bf16.msra.mxu0 %v1528_v40 }
  0x9e   :  { %814 = vmatprep.subr.bf16.mxu0 %v1533_v41  ;;  %1355 = vmatpush3.bf16.msra.mxu1 %v1567_v7 }
  0x9f   :  { %1371 = vmatprep.subr.bf16.mxu1 %v1695_v8 }
  0xa1   :  { %815 = vmatpush2.bf16.msra.mxu0 %v1531_v42 }
  0xa2   :  { %816 = vmatprep.subr.bf16.mxu0 %v1536_v43 }
  0xa5   :  { %817 = vmatpush2.bf16.msra.mxu0 %v1534_v44 }
  0xa6   :  { %818 = vmatprep.subr.bf16.mxu0 %v1539_v45 }
  0xa9   :  { %819 = vmatpush2.bf16.msra.mxu0 %v1537_v46 }
  0xaa   :  { %820 = vmatprep.subr.bf16.mxu0 %v1542_v47 }
  0xad   :  { %821 = vmatpush2.bf16.msra.mxu0 %v1540_v48 }
  0xae   :  { %822 = vmatprep.subr.bf16.mxu0 %v1545_v49 }
  0xb1   :  { %823 = vmatpush2.bf16.msra.mxu0 %v1543_v50 }
  0xb2   :  { %824 = vmatprep.subr.bf16.mxu0 %v1551_v51 }
  0xb5   :  { %825 = vmatpush2.bf16.msra.mxu0 %v1549_v52 }
  0xb8   :  { %827 = vmatmul.mubr.bf16.vlgmr.msra.gmra.mxu0 %v101_v55  ;;  %v1569_v55 = vld [vmem:[#allocation8 + $0x30] sm:$0xff]  }
 0x138   :  { %v742_v12 = vpop.f32.mrf.mxu0 }
 0x139   :  { %v785_v10 = vpop.f32.mrf.mxu1  ;;  %v743_v25 = vadd.f32 %v742_v12, %v207_v20 }
 0x13a   :  { %v744_v17 = vpop.f32.mrf.mxu0 }
 0x13b   :  { %v787_v13 = vpop.f32.mrf.mxu1  ;;  %v745_v24 = vadd.f32 %v744_v17, %v211_v19  ;;  %v786_v32 = vadd.f32 %v785_v10, %v743_v25 }
 0x13c   :  { %v746_v21 = vpop.f32.mrf.mxu0 }
 0x13d   :  { %v789_v18 = vpop.f32.mrf.mxu1  ;;  %v747_v27 = vadd.f32 %v746_v21, %v207_v20  ;;  %v788_v30 = vadd.f32 %v787_v13, %v745_v24 }
 0x13e   :  { %v748_v26 = vpop.f32.mrf.mxu0 }
 0x13f   :  { %v791_v22 = vpop.f32.mrf.mxu1  ;;  %v749_v31 = vadd.f32 %v748_v26, %v211_v19  ;;  %v790_v34 = vadd.f32 %v789_v18, %v747_v27 }
 0x141   :  { %v871_v23 = vpop.f32.mrf.mxu1  ;;  %v792_v39 = vadd.f32 %v791_v22, %v749_v31 }
 0x143   :  { %v873_v28 = vpop.f32.mrf.mxu1 }
 0x145   :  { %v875_v37 = vpop.f32.mrf.mxu1 }
 0x147   :  { %v877_v46 = vpop.f32.mrf.mxu1 }
 0x178   :  { %v828_v29 = vpop.f32.mrf.mxu0 }
 0x179   :  { %v829_v36 = vadd.f32 %v828_v29, %v786_v32 }
 0x17a   :  { %v830_v33 = vpop.f32.mrf.mxu0 }
 0x17b   :  { %v831_v35 = vadd.f32 %v830_v33, %v788_v30  ;;  %v872_v45 = vadd.f32 %v871_v23, %v829_v36 }
 0x17c   :  { %v832_v38 = vpop.f32.mrf.mxu0 }
 0x17d   :  { %v833_v40 = vadd.f32 %v832_v38, %v790_v34  ;;  %v874_v42 = vadd.f32 %v873_v28, %v831_v35  ;;  %v880_v51 = vmax.f32 %v872_v45, 0.0 }
 0x17e   :  { %v834_v41 = vpop.f32.mrf.mxu0 }
 0x17f   :  { %v876_v43 = vadd.f32 %v875_v37, %v833_v40  ;;  %v835_v44 = vadd.f32 %v834_v41, %v792_v39  ;;  %v881_v49 = vmax.f32 %v874_v42, 0.0 }
 0x181   :  { %v878_v47 = vadd.f32 %v877_v46, %v835_v44  ;;  %v882_v48 = vmax.f32 %v876_v43, 0.0 }
 0x183   :  { %v883_v50 = vmax.f32 %v878_v47, 0.0  ;;  %v884_v54 = vpack.c.bf16 %v882_v48, %v880_v51 }
 0x185   :  { %v885_v52 = vpack.c.bf16 %v883_v50, %v881_v49 }
 0x187   :  { %1053 = vmatprep.mubr.bf16.mxu1 %v885_v52 }
 0x188   :  { %1054 = vmatmul.mubr.bf16.vlgmr.msra.gmra.mxu1 %v884_v54 }
 0x189   :  { %1372 = vmatpush3.bf16.msra.mxu1 %v1568_v53  ;;  %1387 = vmatprep.mubr.msk.bf16.mxu1 %vm1696_vm1, %v1695_v8 }
 0x18a   :  { %1373 = vmatprep.subr.bf16.mxu1 %v1695_v8 }
 0x18d   :  { %1374 = vmatpush3.bf16.msra.mxu1 %v1569_v55 }
 0x18e   :  { %1375 = vmatprep.subr.bf16.mxu1 %v1695_v8 }
 0x191   :  { %1376 = vmatpush3.bf16.msra.mxu1 %v1570_v56 }
 0x192   :  { %1377 = vmatprep.subr.bf16.mxu1 %v1695_v8 }
 0x195   :  { %1378 = vmatpush3.bf16.msra.mxu1 %v1571_v57 }
 0x196   :  { %1379 = vmatprep.subr.bf16.mxu1 %v1695_v8 }
 0x199   :  { %1380 = vmatpush3.bf16.msra.mxu1 %v1572_v58 }
 0x19a   :  { %1381 = vmatprep.subr.bf16.mxu1 %v1695_v8 }
 0x19d   :  { %1382 = vmatpush3.bf16.msra.mxu1 %v1573_v59 }
 0x19e   :  { %1383 = vmatprep.subr.bf16.mxu1 %v1695_v8 }
 0x1a1   :  { %1384 = vmatpush3.bf16.msra.mxu1 %v1574_v60 }
 0x1a2   :  { %1385 = vmatprep.subr.bf16.mxu1 %v1695_v8  ;;  %v1322_v8 = vld [vmem:[%s1786_s6] ss:$0 sm:$0xff] }
 0x1a5   :  { %1386 = vmatpush3.bf16.msra.mxu1 %v1575_v61 }
 0x248   :  { %v1356_v62 = vpop.f32.mrf.mxu1 }
 0x24a   :  { %v1357_v63 = vpop.f32.mrf.mxu1 }
 0x24b   :  { %v1358_v0 = vadd.f32 %v1357_v63, %v1356_v62 }
 0x24c   :  { %v1359_v2 = vpop.f32.mrf.mxu1 }
 0x24d   :  { %v1056_v4 = vadd.f32 %v1358_v0, %v1305_v1 }
 0x24e   :  { %v1360_v3 = vpop.f32.mrf.mxu1 }
 0x24f   :  { %v1361_v5 = vadd.f32 %v1360_v3, %v1359_v2  ;;  %v1062_v7 = vmax.f32 %v1056_v4, 0.0 }
 0x251   :  { %v1059_v6 = vadd.f32 %v1361_v5, %v1305_v1 }
 0x253   :  { %v1063_v9 = vmax.f32 %v1059_v6, 0.0 }
 0x255   :  { %v1064_v10 = vpack.c.bf16 %v1063_v9, %v1062_v7 }
 0x257   :  { %1388 = vmatmul.mubr.bf16.vlgmr.msra.gmra.mxu1 %v1064_v10 }
 0x317   :  { %v1170_v11 = vpop.f32.mrf.mxu1 }
 0x318   :  { %v1171_v14 = vadd.f32 %v1322_v8, %v1170_v11 }
 0x319   :  { %v1389_v12 = vpop.f32.mrf.mxu1 }
 0x31b   :  { %v1173_v13 = vpop.f32.mrf.mxu1 }
 0x31c   :  { %v1174_v15 = vadd.f32 %v1322_v8, %v1173_v13 }
 0x31d   :  { %v1390_v16 = vpop.f32.mrf.mxu1 }
 0x31e   :  { %v1338_v17 = vpack.c.bf16 %v1174_v15, %v1171_v14 }
 0x320   :  { %1339 = vst [vmem:[#allocation10] sm:$0xff] %v1338_v17  }
 0x321   :  { %1667 = shalt.err (!%p1664_p10)
}
 0x322   :  { %1198 = dma.vmem_to_hbm [thread:$0]  %s1193_s29, 128, %s1787_s7, [#allocation4], %s1691_s17, %s1691_s17, %s1692_s18  }
 0x323   :  { %1682 = dma.done.wait [#allocation4], 128  }
 0x324   :  { %1683 = vsyncadd [#allocation4], 4294967168 }
 0x325   :  { %1202 = vsyncpa [#allocation3], 1 }
 0x326   :  { %1203 = vsyncpa [#allocation6], 1 }
 0x327   :  { %1204 = vsyncpa [#allocation9], 1 }
 0x328   :  { %1205 = vsyncpa [#allocation4], 1 }

</bundles_post_ra>
